<compile_context>
chip_gen: v5e
topology: v5e:2x2
jax: 0.10.0
libtpu: 0.0.40
codegen_flags: <defaults>
</compile_context>

<pallas_src>
import functools

import jax
import jax.numpy as jnp
from jax import lax
from jax.experimental import pallas as pl
from jax.experimental.pallas import tpu as pltpu

EPS = 1e-6
_TARGET_BLOCK_BYTES = 4 << 20   # combined preds+targets bytes per pipelined block
_ROW_BLOCK_CAP = 256            # max rows per block


def _dice_bce_kernel(p_ref, t_ref, o_ref, inter_ref, denom_ref, bce_ref,
                     *, s_actual, s_tile, mask_tail):
    s_idx = pl.program_id(1)
    n_s = pl.num_programs(1)

    @pl.when(s_idx == 0)
    def _init():
        inter_ref[...] = jnp.zeros_like(inter_ref)
        denom_ref[...] = jnp.zeros_like(denom_ref)
        bce_ref[...] = jnp.zeros_like(bce_ref)

    p = p_ref[...].astype(jnp.float32)
    t = t_ref[...].astype(jnp.float32)

    # One EUP exp feeds both the stable sigmoid (dice) and the BCE softplus.
    e = jnp.exp(-jnp.abs(p))                       # exp(-|x|) in (0, 1]
    inv = pl.reciprocal(1.0 + e, approx=False)     # explicit (exact) reciprocal
    sig = jnp.where(p >= 0.0, 1.0, e) * inv        # numerically-stable sigmoid
    # Stable BCE-with-logits: max(x, 0) - x*z + log1p(exp(-|x|))
    bce_elem = jnp.maximum(p, 0.0) - p * t + jnp.log1p(e)

    def _accumulate(sig_v, t_v, bce_v):
        inter_ref[...] += jnp.sum(sig_v * t_v, axis=-1, keepdims=True)
        denom_ref[...] += jnp.sum(sig_v + t_v, axis=-1, keepdims=True)
        bce_ref[...] += jnp.sum(bce_v, axis=-1, keepdims=True)

    if mask_tail:
        # Only the last spatial block is ragged; mask it there and nowhere else.
        @pl.when(s_idx != n_s - 1)
        def _accum_full():
            _accumulate(sig, t, bce_elem)

        @pl.when(s_idx == n_s - 1)
        def _accum_masked():
            col = s_idx * s_tile + lax.broadcasted_iota(jnp.int32, p.shape, 1)
            valid = col < s_actual
            _accumulate(jnp.where(valid, sig, 0.0),
                        jnp.where(valid, t, 0.0),
                        jnp.where(valid, bce_elem, 0.0))
    else:
        _accumulate(sig, t, bce_elem)

    @pl.when(s_idx == n_s - 1)
    def _finalize():
        # Rows past N (ragged last row block) produce dice == 1 or garbage, but
        # their output rows are out-of-bounds and dropped at writeback.
        dice = (2.0 * inter_ref[...] + EPS) / (denom_ref[...] + EPS)
        o_ref[:, 0:1] = 1.0 - dice        # per-row dice-loss contribution
        o_ref[:, 1:2] = bce_ref[...]      # per-row BCE sum


def dice_bce_loss(preds, targets, *, row_block=None, s_tile=None):
    """preds, targets: (B, C, H, W), any float dtype. Returns scalar f32 loss."""
    B, C, H, W = preds.shape
    N = B * C
    S = H * W
    p2 = preds.reshape(N, S)
    t2 = targets.reshape(N, S)
    elem_bytes = p2.dtype.itemsize + t2.dtype.itemsize

    # --- row tiling: multiple of 8 (or N itself). >1 row block lets v7x's two
    #     TensorCores split the "parallel" axis and bounds block height for big N.
    if row_block is None:
        if N <= 16:
            row_block = N
        else:
            row_block = min(_ROW_BLOCK_CAP, max(8, (((N + 1) // 2) // 8) * 8))
    row_block = int(row_block)
    n_row_blocks = pl.cdiv(N, row_block)

    # --- spatial tiling: lane-aligned tile sized for ~_TARGET_BLOCK_BYTES per
    #     pipelined block; small S collapses to a single full-extent block.
    if s_tile is None:
        s_tile = max(128, _TARGET_BLOCK_BYTES // (row_block * elem_bytes))
    s_tile = int(s_tile)
    if s_tile >= S:
        s_tile = S
    else:
        s_tile = max(128, (s_tile // 128) * 128)
        if s_tile >= S:
            s_tile = S
    n_s_tiles = pl.cdiv(S, s_tile)
    mask_tail = (S % s_tile) != 0

    kernel = functools.partial(
        _dice_bce_kernel, s_actual=S, s_tile=s_tile, mask_tail=mask_tail)

    block_bytes = row_block * s_tile * elem_bytes            # one buffer pair
    vmem_limit = int(min(48 << 20, max(16 << 20, 4 * block_bytes)))

    out = pl.pallas_call(
        kernel,
        out_shape=jax.ShapeDtypeStruct((N, 2), jnp.float32),
        grid_spec=pltpu.PrefetchScalarGridSpec(
            num_scalar_prefetch=0,
            grid=(n_row_blocks, n_s_tiles),
            in_specs=[
                pl.BlockSpec((row_block, s_tile), lambda r, s: (r, s)),
                pl.BlockSpec((row_block, s_tile), lambda r, s: (r, s)),
            ],
            out_specs=pl.BlockSpec((row_block, 2), lambda r, s: (r, 0)),
            scratch_shapes=[
                pltpu.VMEM((row_block, 1), jnp.float32),  # intersection
                pltpu.VMEM((row_block, 1), jnp.float32),  # sum_p + sum_t (merged)
                pltpu.VMEM((row_block, 1), jnp.float32),  # bce row sums
            ],
        ),
        compiler_params=pltpu.CompilerParams(
            dimension_semantics=("parallel", "arbitrary"),
            vmem_limit_bytes=vmem_limit,
        ),
        cost_estimate=pl.CostEstimate(
            flops=12 * N * S,
            transcendentals=3 * N * S,   # exp, log1p, reciprocal
            bytes_accessed=(p2.size * p2.dtype.itemsize
                            + t2.size * t2.dtype.itemsize + N * 2 * 4),
        ),
    )(p2, t2)

    # Tiny final combine in JAX (kept outside so per-row-block outputs stay
    # disjoint across TensorCores on v7x).
    dice_loss = jnp.sum(out[:, 0]) / N
    bce_mean = jnp.sum(out[:, 1]) / (N * S)
    return dice_loss + bce_mean


def _reference(preds, targets):
    # Pure-JAX mirror of the PyTorch DiceBCELoss module.
    x = preds.astype(jnp.float32)
    z = targets.astype(jnp.float32)
    B, C = preds.shape[:2]
    p = jax.nn.sigmoid(x)
    pf = p.reshape(B, C, -1)
    tf = z.reshape(B, C, -1)
    inter = jnp.sum(pf * tf, -1)
    dice = (2.0 * inter + EPS) / (jnp.sum(pf, -1) + jnp.sum(tf, -1) + EPS)
    dice_loss = jnp.mean(1.0 - dice)
    bce = jnp.mean(jnp.maximum(x, 0.0) - x * z + jnp.log1p(jnp.exp(-jnp.abs(x))))
    return bce + dice_loss


if __name__ == "__main__":
    key = jax.random.PRNGKey(0)
    keys = jax.random.split(key, 10)

    def check(preds, targets, **kw):
        got = jax.block_until_ready(dice_bce_loss(preds, targets, **kw))
        ref = jax.block_until_ready(_reference(preds, targets))
        assert jnp.allclose(got, ref, rtol=1e-5, atol=1e-5), (got, ref, kw)

    # 1) Module-sized case (B=2, C=4, 16x16): single full-extent block.
    p1 = jax.random.normal(keys[0], (2, 4, 16, 16), dtype=jnp.float32)
    t1 = (jax.random.uniform(keys[1], (2, 4, 16, 16)) > 0.5).astype(jnp.float32)
    check(p1, t1)

    # 2) Ragged spatial extent (H*W = 100 < 128): full-extent lane block, no pad.
    p2 = jax.random.normal(keys[2], (2, 3, 10, 10), dtype=jnp.float32)
    t2 = (jax.random.uniform(keys[3], (2, 3, 10, 10)) > 0.5).astype(jnp.float32)
    check(p2, t2)

    # 3) Multi-tile spatial reduction with a ragged (masked) last tile:
    #    S=4800, s_tile=128 -> 38 tiles, last tile has 64 out-of-bounds lanes.
    p3 = jax.random.normal(keys[4], (2, 4, 48, 100), dtype=jnp.float32)
    t3 = (jax.random.uniform(keys[5], (2, 4, 48, 100)) > 0.5).astype(jnp.float32)
    check(p3, t3, s_tile=128)

    # 4) Multiple row blocks ("parallel" axis) x multiple spatial tiles:
    #    N=32 -> row_block=16 (2 blocks), S=1024 / s_tile=256 -> 4 tiles.
    p4 = jax.random.normal(keys[6], (4, 8, 32, 32), dtype=jnp.float32)
    t4 = (jax.random.uniform(keys[7], (4, 8, 32, 32)) > 0.5).astype(jnp.float32)
    check(p4, t4, s_tile=256)

    # 5) Narrow input dtype (bf16) streamed as-is; math is f32 in-register.
    p5 = jax.random.normal(keys[8], (2, 4, 16, 16), dtype=jnp.bfloat16)
    t5 = (jax.random.uniform(keys[9], (2, 4, 16, 16)) > 0.5).astype(jnp.bfloat16)
    check(p5, t5)

    print("KERNEL_OK")
</pallas_src>

<mosaic_0001>
module attributes {stable_mosaic.version = 11 : i64} {
  func.func @_dice_bce_kernel(%arg0: i32, %arg1: i32, %arg2: memref<8x256xf32, #tpu.memory_space<vmem>>, %arg3: memref<8x256xf32, #tpu.memory_space<vmem>>, %arg4: memref<8x2xf32, #tpu.memory_space<vmem>>, %arg5: memref<8x1xf32, #tpu.memory_space<vmem>>, %arg6: memref<8x1xf32, #tpu.memory_space<vmem>>, %arg7: memref<8x1xf32, #tpu.memory_space<vmem>>) attributes {dimension_semantics = [#tpu.dimension_semantics<parallel>, #tpu.dimension_semantics<arbitrary>], iteration_bounds = array<i64: 1, 1>, scalar_prefetch = 0 : i64, scratch_operands = 3 : i64, tpu.core_type = #tpu.core_type<tc>, window_params = [{transform_indices = @transform_0, window_bounds = array<i64: 8, 256>}, {transform_indices = @transform_1, window_bounds = array<i64: 8, 256>}, {transform_indices = @transform_2, window_bounds = array<i64: 8, 2>}]} {
    %c0_i32 = arith.constant 0 : i32
    %0 = arith.cmpi eq, %arg1, %c0_i32 : i32
    %1 = arith.extui %0 : i1 to i32
    %c0_i32_0 = arith.constant 0 : i32
    %2 = arith.cmpi ne, %1, %c0_i32_0 : i32
    scf.if %2 {
      %cst_25 = arith.constant 0.000000e+00 : f32
      %43 = vector.broadcast %cst_25 : f32 to vector<8x1xf32>
      %c0_26 = arith.constant 0 : index
      %c0_27 = arith.constant 0 : index
      %44 = vector.load %arg5[%c0_26, %c0_27] : memref<8x1xf32, #tpu.memory_space<vmem>>, vector<8x1xf32>
      tpu.vector_store %arg5[%c0_26, %c0_27], %43 {strides = array<i32>} : memref<8x1xf32, #tpu.memory_space<vmem>>, vector<8x1xf32>,
      %cst_28 = arith.constant 0.000000e+00 : f32
      %45 = vector.broadcast %cst_28 : f32 to vector<8x1xf32>
      %c0_29 = arith.constant 0 : index
      %c0_30 = arith.constant 0 : index
      %46 = vector.load %arg6[%c0_29, %c0_30] : memref<8x1xf32, #tpu.memory_space<vmem>>, vector<8x1xf32>
      tpu.vector_store %arg6[%c0_29, %c0_30], %45 {strides = array<i32>} : memref<8x1xf32, #tpu.memory_space<vmem>>, vector<8x1xf32>,
      %cst_31 = arith.constant 0.000000e+00 : f32
      %47 = vector.broadcast %cst_31 : f32 to vector<8x1xf32>
      %c0_32 = arith.constant 0 : index
      %c0_33 = arith.constant 0 : index
      %48 = vector.load %arg7[%c0_32, %c0_33] : memref<8x1xf32, #tpu.memory_space<vmem>>, vector<8x1xf32>
      tpu.vector_store %arg7[%c0_32, %c0_33], %47 {strides = array<i32>} : memref<8x1xf32, #tpu.memory_space<vmem>>, vector<8x1xf32>,
    } else {
    }
    %c0 = arith.constant 0 : index
    %c0_1 = arith.constant 0 : index
    %3 = vector.load %arg2[%c0, %c0_1] : memref<8x256xf32, #tpu.memory_space<vmem>>, vector<8x256xf32>
    %c0_2 = arith.constant 0 : index
    %c0_3 = arith.constant 0 : index
    %4 = vector.load %arg3[%c0_2, %c0_3] : memref<8x256xf32, #tpu.memory_space<vmem>>, vector<8x256xf32>
    %5 = math.absf %3 : vector<8x256xf32>
    %cst = arith.constant 0.000000e+00 : f32
    %6 = vector.broadcast %cst : f32 to vector<8x256xf32>
    %7 = arith.subf %6, %5 : vector<8x256xf32>
    %8 = math.exp %7 : vector<8x256xf32>
    %cst_4 = arith.constant 1.000000e+00 : f32
    %9 = vector.broadcast %cst_4 : f32 to vector<8x256xf32>
    %10 = arith.addf %9, %8 : vector<8x256xf32>
    %11 = tpu.reciprocal %10 : vector<8x256xf32> -> vector<8x256xf32>
    %cst_5 = arith.constant 0.000000e+00 : f32
    %12 = vector.broadcast %cst_5 : f32 to vector<8x256xf32>
    %13 = arith.cmpf oge, %3, %12 : vector<8x256xf32>
    %cst_6 = arith.constant 1.000000e+00 : f32
    %14 = vector.broadcast %cst_6 : f32 to vector<8x256xf32>
    %15 = arith.select %13, %14, %8 : vector<8x256xi1>, vector<8x256xf32>
    %16 = arith.mulf %15, %11 : vector<8x256xf32>
    %cst_7 = arith.constant 0.000000e+00 : f32
    %17 = vector.broadcast %cst_7 : f32 to vector<8x256xf32>
    %18 = arith.maximumf %3, %17 : vector<8x256xf32>
    %19 = arith.mulf %3, %4 : vector<8x256xf32>
    %20 = arith.subf %18, %19 : vector<8x256xf32>
    %21 = math.log1p %8 : vector<8x256xf32>
    %22 = arith.addf %20, %21 : vector<8x256xf32>
    %c0_8 = arith.constant 0 : index
    %c0_9 = arith.constant 0 : index
    %23 = vector.load %arg5[%c0_8, %c0_9] : memref<8x1xf32, #tpu.memory_space<vmem>>, vector<8x1xf32>
    %24 = arith.mulf %16, %4 : vector<8x256xf32>
    %cst_10 = arith.constant dense<0.000000e+00> : vector<8xf32>
    %25 = vector.multi_reduction <add>, %24, %cst_10 [1] : vector<8x256xf32> to vector<8xf32>
    %26 = vector.shape_cast %25 : vector<8xf32> to vector<8x1xf32>
    %27 = arith.addf %23, %26 : vector<8x1xf32>
    %c0_11 = arith.constant 0 : index
    %c0_12 = arith.constant 0 : index
    %28 = vector.load %arg5[%c0_11, %c0_12] : memref<8x1xf32, #tpu.memory_space<vmem>>, vector<8x1xf32>
    tpu.vector_store %arg5[%c0_11, %c0_12], %27 {strides = array<i32>} : memref<8x1xf32, #tpu.memory_space<vmem>>, vector<8x1xf32>,
    %c0_13 = arith.constant 0 : index
    %c0_14 = arith.constant 0 : index
    %29 = vector.load %arg6[%c0_13, %c0_14] : memref<8x1xf32, #tpu.memory_space<vmem>>, vector<8x1xf32>
    %30 = arith.addf %16, %4 : vector<8x256xf32>
    %cst_15 = arith.constant dense<0.000000e+00> : vector<8xf32>
    %31 = vector.multi_reduction <add>, %30, %cst_15 [1] : vector<8x256xf32> to vector<8xf32>
    %32 = vector.shape_cast %31 : vector<8xf32> to vector<8x1xf32>
    %33 = arith.addf %29, %32 : vector<8x1xf32>
    %c0_16 = arith.constant 0 : index
    %c0_17 = arith.constant 0 : index
    %34 = vector.load %arg6[%c0_16, %c0_17] : memref<8x1xf32, #tpu.memory_space<vmem>>, vector<8x1xf32>
    tpu.vector_store %arg6[%c0_16, %c0_17], %33 {strides = array<i32>} : memref<8x1xf32, #tpu.memory_space<vmem>>, vector<8x1xf32>,
    %c0_18 = arith.constant 0 : index
    %c0_19 = arith.constant 0 : index
    %35 = vector.load %arg7[%c0_18, %c0_19] : memref<8x1xf32, #tpu.memory_space<vmem>>, vector<8x1xf32>
    %cst_20 = arith.constant dense<0.000000e+00> : vector<8xf32>
    %36 = vector.multi_reduction <add>, %22, %cst_20 [1] : vector<8x256xf32> to vector<8xf32>
    %37 = vector.shape_cast %36 : vector<8xf32> to vector<8x1xf32>
    %38 = arith.addf %35, %37 : vector<8x1xf32>
    %c0_21 = arith.constant 0 : index
    %c0_22 = arith.constant 0 : index
    %39 = vector.load %arg7[%c0_21, %c0_22] : memref<8x1xf32, #tpu.memory_space<vmem>>, vector<8x1xf32>
    tpu.vector_store %arg7[%c0_21, %c0_22], %38 {strides = array<i32>} : memref<8x1xf32, #tpu.memory_space<vmem>>, vector<8x1xf32>,
    %c0_i32_23 = arith.constant 0 : i32
    %40 = arith.cmpi eq, %arg1, %c0_i32_23 : i32
    %41 = arith.extui %40 : i1 to i32
    %c0_i32_24 = arith.constant 0 : i32
    %42 = arith.cmpi ne, %41, %c0_i32_24 : i32
    scf.if %42 {
      %c0_25 = arith.constant 0 : index
      %c0_26 = arith.constant 0 : index
      %43 = vector.load %arg5[%c0_25, %c0_26] : memref<8x1xf32, #tpu.memory_space<vmem>>, vector<8x1xf32>
      %cst_27 = arith.constant 2.000000e+00 : f32
      %44 = vector.broadcast %cst_27 : f32 to vector<8x1xf32>
      %45 = arith.mulf %44, %43 : vector<8x1xf32>
      %cst_28 = arith.constant 9.99999997E-7 : f32
      %46 = vector.broadcast %cst_28 : f32 to vector<8x1xf32>
      %47 = arith.addf %45, %46 : vector<8x1xf32>
      %c0_29 = arith.constant 0 : index
      %c0_30 = arith.constant 0 : index
      %48 = vector.load %arg6[%c0_29, %c0_30] : memref<8x1xf32, #tpu.memory_space<vmem>>, vector<8x1xf32>
      %cst_31 = arith.constant 9.99999997E-7 : f32
      %49 = vector.broadcast %cst_31 : f32 to vector<8x1xf32>
      %50 = arith.addf %48, %49 : vector<8x1xf32>
      %51 = arith.divf %47, %50 : vector<8x1xf32>
      %cst_32 = arith.constant 1.000000e+00 : f32
      %52 = vector.broadcast %cst_32 : f32 to vector<8x1xf32>
      %53 = arith.subf %52, %51 : vector<8x1xf32>
      %c0_33 = arith.constant 0 : index
      %c0_34 = arith.constant 0 : index
      %54 = vector.load %arg4[%c0_33, %c0_34] : memref<8x2xf32, #tpu.memory_space<vmem>>, vector<8x1xf32>
      tpu.vector_store %arg4[%c0_33, %c0_34], %53 {strides = array<i32>} : memref<8x2xf32, #tpu.memory_space<vmem>>, vector<8x1xf32>,
      %c0_35 = arith.constant 0 : index
      %c0_36 = arith.constant 0 : index
      %55 = vector.load %arg7[%c0_35, %c0_36] : memref<8x1xf32, #tpu.memory_space<vmem>>, vector<8x1xf32>
      %c0_37 = arith.constant 0 : index
      %c1 = arith.constant 1 : index
      %56 = vector.load %arg4[%c0_37, %c1] : memref<8x2xf32, #tpu.memory_space<vmem>>, vector<8x1xf32>
      tpu.vector_store %arg4[%c0_37, %c1], %55 {strides = array<i32>} : memref<8x2xf32, #tpu.memory_space<vmem>>, vector<8x1xf32>,
    } else {
    }
    return
  }
  func.func @transform_0(%arg0: i32, %arg1: i32) -> (i32, i32) {
    %c0_i32 = arith.constant 0 : i32
    return %arg0, %arg1 : i32, i32
  }
  func.func @transform_1(%arg0: i32, %arg1: i32) -> (i32, i32) {
    %c0_i32 = arith.constant 0 : i32
    return %arg0, %arg1 : i32, i32
  }
  func.func @transform_2(%arg0: i32, %arg1: i32) -> (i32, i32) {
    %c0_i32 = arith.constant 0 : i32
    %c0_i32_0 = arith.constant 0 : i32
    return %arg0, %c0_i32 : i32, i32
  }
}

</mosaic_0001>

<bundles_post_ra>
// kernel: tpu_custom_call.1
= control target key start
LH: loop header
LB: loop body
LE: loop exit
PB: predicated region body
PF: predicated region fallthrough
CT: control target
= control target key end

     0   :  { %7 = vsyncpa [#allocation6], 0  ;;  %s328_s0 = inlined_call_operand.hbm [shape: f32[8,256], index: 0, kind: input, shape index: {}]   ;;  %s329_s1 = inlined_call_operand.hbm [shape: f32[8,256], index: 1, kind: input, shape index: {}]   ;;  %s330_s2 = inlined_call_operand.vmem [shape: f32[8,2], index: 2, kind: output, shape index: {}]  }
   0x1   :  { %s14_s11 = sshll.u32 %s328_s0, 4  ;;  %s15_s11 = int_to_ptr.hbm [resolvable:$true] %s14_s11 }
   0x2   :  { %8 = vsyncpa [#allocation8], 0  ;;  %s252_s12 = smov [#allocation5]   ;;  %s25_s16 = sshll.u32 %s329_s1, 4  ;;  %s26_s16 = int_to_ptr.hbm [resolvable:$true] %s25_s16 }
   0x3   :  { %s16_s13 = sshll.u32 %s252_s12, 4  ;;  %s253_s17 = smov [#allocation7]   ;;  %s17_s13 = int_to_ptr.vmem [resolvable:$true] %s16_s13 }
   0x4   :  { %19 = dma.hbm_to_vmem [thread:$0]  %s15_s11, 256, %s17_s13, [#allocation6]  }
   0x5   :  { %s27_s18 = sshll.u32 %s253_s17, 4  ;;  %s28_s18 = int_to_ptr.vmem [resolvable:$true] %s27_s18 }
   0x6   :  { %30 = dma.hbm_to_vmem [thread:$0]  %s26_s16, 256, %s28_s18, [#allocation8]  }
   0x7   :  { %248 = dma.done.wait [#allocation6], 256  }
   0x8   :  { %249 = vsyncadd [#allocation6], 4294967040 }
   0x9   :  { %250 = dma.done.wait [#allocation8], 256  }
   0xa   :  { %251 = vsyncadd [#allocation8], 4294967040  ;;  %v277_v0 = vld [vmem:[#allocation5] sm:$0xff]  ;;  %v279_v1 = vld [vmem:[#allocation5 + $0x8] sm:$0xff]  ;;  %vm43_vm0 = vcmask 7168   ;;  %v254_v8 = vmov 0.0  }
   0xb   :  { %v51_v2 = vand.u32 2147483647, %v277_v0  ;;  %v52_v3 = vand.u32 2147483647, %v279_v1  ;;  %46 = vst.msk [vmem:[#allocation4] sm:$0xff] %vm43_vm0, %v254_v8  ;;  %v290_v13 = vld [vmem:[#allocation7] sm:$0xff] }
   0xc   :  { %44 = vst.msk [vmem:[#allocation2] sm:$0xff] %vm43_vm0, %v254_v8  ;;  %v292_v16 = vld [vmem:[#allocation7 + $0x8] sm:$0xff]  ;;  %v95_v18 = vmax.f32 %v277_v0, 0.0  ;;  %v97_v19 = vmul.f32 %v290_v13, %v277_v0  ;;  %v96_v21 = vmax.f32 %v279_v1, 0.0  ;;  %vm90_vm4 = vcmp.ge.f32.partialorder %v279_v1, 0.0  ;;  %s255_s0 = smov 1  }
   0xd   :  { %v53_v4 = vsub.f32 0.0, %v51_v2  ;;  %v54_v5 = vsub.f32 0.0, %v52_v3  ;;  %45 = vst.msk [vmem:[#allocation3] sm:$0xff] %vm43_vm0, %v254_v8  ;;  %v98_v22 = vmul.f32 %v292_v16, %v279_v1  ;;  %vm89_vm9 = vcmp.ge.f32.partialorder %v277_v0, 0.0 }
   0xe   :  { %v99_v27 = vsub.f32 %v95_v18, %v97_v19 }
   0xf   :  { %v55_v6 = vmul.f32 1.442695, %v53_v4  ;;  %v57_v7 = vmul.f32 1.442695, %v54_v5  ;;  %v100_v29 = vsub.f32 %v96_v21, %v98_v22 }
  0x11   :  { %186 = vpow2.f32 %v55_v6 }
  0x12   :  { %188 = vpow2.f32 %v57_v7  ;;  %v138_v5 = vld [vmem:[#allocation4] sm:$0xff] }
  0x14   :  { %v130_v8 = vld [vmem:[#allocation3] sm:$0xff] }
  0x17   :  { %v285_v9 = vpop.eup %186 }
  0x18   :  { %v189_v10 = vpop.eup %188  ;;  %v59_v11 = vadd.f32 1.0, %v285_v9  ;;  %v104_v12 = vmul.f32 -0.5, %v285_v9  ;;  %v107_v20 = vand.u32 2147483647, %v285_v9  ;;  %v91_v58 = vsel %vm89_vm9, 1.0, %v285_v9 }
  0x19   :  { %v60_v14 = vadd.f32 1.0, %v189_v10  ;;  %v113_v15 = vmul.f32 -0.5, %v189_v10  ;;  %v116_v24 = vand.u32 2147483647, %v189_v10  ;;  %v92_v54 = vsel %vm90_vm4, 1.0, %v189_v10 }
  0x1a   :  { %190 = vlog2.f32 %v59_v11  ;;  %v105_v17 = vadd.f32 1.0, %v104_v12  ;;  %vm108_vm1 = vcmp.lt.f32.partialorder %v107_v20, 0.0004427343  ;;  %vm66_vm6 = vweird.f32 %v59_v11 }
  0x1b   :  { %192 = vrcp.f32 %v60_v14  ;;  %v114_v23 = vadd.f32 1.0, %v113_v15  ;;  %vm302_vm2 = vcmp.lt.f32.partialorder %v116_v24, 0.0004427343  ;;  %vm80_vm3 = vweird.f32 %v60_v14 }
  0x1c   :  { %194 = vlog2.f32 %v60_v14  ;;  %v106_v25 = vmul.f32 %v285_v9, %v105_v17  ;;  %v84_v38 = vand.u32 2147483647, %v60_v14  ;;  %v86_v39 = vand.u32 2147483648, %v60_v14  ;;  %v121_v9 = vld [vmem:[#allocation2] sm:$0xff] }
  0x1d   :  { %196 = vrcp.f32 %v59_v11  ;;  %v115_v31 = vmul.f32 %v189_v10, %v114_v23  ;;  %v70_v44 = vand.u32 2147483647, %v59_v11  ;;  %v72_v45 = vand.u32 2147483648, %v59_v11 }
  0x1e   :  { %v87_v49 = vor.u32 1.1754944e-38, %v86_v39  ;;  %vm85_vm10 = vcmp.eq.f32.partialorder %v84_v38, 8.507059e+37 }
  0x1f   :  { %v73_v53 = vor.u32 1.1754944e-38, %v72_v45  ;;  %vm71_vm12 = vcmp.eq.f32.partialorder %v70_v44, 8.507059e+37 }
  0x20   :  { %v191_v26 = vpop.eup %190 }
  0x21   :  { %v193_v28 = vpop.eup %192  ;;  %v103_v30 = vmul.f32 0.6931472, %v191_v26 }
  0x22   :  { %v195_v32 = vpop.eup %194  ;;  %v76_v34 = vmul.f32 %v193_v28, %v60_v14  ;;  %vm81_vm5 = vweird.f32 %v193_v28 }
  0x23   :  { %v197_v35 = vpop.eup %196  ;;  %v109_v36 = vsel %vm108_vm1, %v106_v25, %v103_v30  ;;  %v112_v37 = vmul.f32 0.6931472, %v195_v32  ;;  %vm82_vm8 = vmor %vm80_vm3, %vm81_vm5 }
  0x24   :  { %v119_v40 = vadd.f32 %v109_v36, %v99_v27  ;;  %v62_v41 = vmul.f32 %v197_v35, %v59_v11  ;;  %v77_v42 = vsub.f32 1.0, %v76_v34  ;;  %vm67_vm7 = vweird.f32 %v197_v35 }
  0x25   :  { %v118_v43 = vsel %vm302_vm2, %v115_v31, %v112_v37  ;;  %vm68_vm11 = vmor %vm66_vm6, %vm67_vm7  ;;  %vm174_vm2 = vcmask 15368  }
  0x26   :  { %v120_v46 = vadd.f32 %v118_v43, %v100_v29  ;;  %v63_v47 = vsub.f32 1.0, %v62_v41  ;;  %v78_v48 = vmul.f32 %v193_v28, %v77_v42 }
  0x28   :  { %v139_v50 = vadd.f32 %v120_v46, %v119_v40  ;;  %v64_v51 = vmul.f32 %v197_v35, %v63_v47  ;;  %v79_v52 = vadd.f32 %v193_v28, %v78_v48 }
  0x2a   :  { %140 = vadd.xlane.f32.xlu0 %v139_v50  ;;  %v65_v55 = vadd.f32 %v197_v35, %v64_v51  ;;  %v83_v56 = vsel %vm82_vm8, %v193_v28, %v79_v52 }
  0x2b   :  { %v88_v57 = vsel %vm85_vm10, %v87_v49, %v83_v56 }
  0x2c   :  { %v69_v59 = vsel %vm68_vm11, %v197_v35, %v65_v55  ;;  %v94_v60 = vmul.f32 %v92_v54, %v88_v57 }
  0x2d   :  { %v74_v61 = vsel %vm71_vm12, %v73_v53, %v69_v59 }
  0x2e   :  { %v93_v62 = vmul.f32 %v91_v58, %v74_v61  ;;  %v132_v63 = vadd.f32 %v94_v60, %v292_v16  ;;  %v123_v0 = vmul.f32 %v94_v60, %v292_v16 }
  0x30   :  { %v131_v2 = vadd.f32 %v93_v62, %v290_v13  ;;  %v122_v1 = vmul.f32 %v93_v62, %v290_v13 }
  0x32   :  { %v133_v3 = vadd.f32 %v132_v63, %v131_v2  ;;  %v124_v4 = vadd.f32 %v123_v0, %v122_v1 }
  0x34   :  { %134 = vadd.xlane.f32.xlu0 %v133_v3  ;;  %125 = vadd.xlane.f32.xlu1 %v124_v4 }
  0x9d   :  { %v141_v6 = vpop.xlane.xlu0 %140 }
  0x9e   :  { %v142_v7 = vadd.f32 %v141_v6, %v138_v5 }
  0xa0   :  { %143 = vst.msk [vmem:[#allocation4] sm:$0xff] %vm43_vm0, %v142_v7 }
  0xa7   :  { %v169_v10 = vld [vmem:[#allocation4] sm:$0xff]  ;;  %v135_v11 = vpop.xlane.xlu0 %134  ;;  %v126_v12 = vpop.xlane.xlu1 %125 }
  0xa8   :  { %171 = vrot.lane.b32.xlu1 %v169_v10, %s255_s0  ;;  %v136_v14 = vadd.f32 %v135_v11, %v130_v8  ;;  %v127_v15 = vadd.f32 %v126_v12, %v121_v9 }
  0xaa   :  { %137 = vst.msk [vmem:[#allocation3] sm:$0xff] %vm43_vm0, %v136_v14 }
  0xab   :  { %129 = vst.msk [vmem:[#allocation2] sm:$0xff] %vm43_vm0, %v127_v15 }
  0xb1   :  { %v150_v13 = vld [vmem:[#allocation3] sm:$0xff] }
  0xb2   :  { %v151_v16 = vadd.f32 1e-06, %v150_v13  ;;  %v147_v21 = vld [vmem:[#allocation2] sm:$0xff] }
  0xb3   :  { %v148_v23 = vmul.f32 2.0, %v147_v21 }
  0xb4   :  { %198 = vrcp.f32 %v151_v16  ;;  %v163_v22 = vand.u32 2147483648, %v151_v16  ;;  %vm157_vm13 = vweird.f32 %v151_v16  ;;  %v161_v25 = vand.u32 2147483647, %v151_v16 }
  0xb5   :  { %v149_v27 = vadd.f32 1e-06, %v148_v23 }
  0xb6   :  { %v164_v26 = vor.u32 1.1754944e-38, %v163_v22  ;;  %vm162_vm1 = vcmp.eq.f32.partialorder %v161_v25, 8.507059e+37 }
  0xba   :  { %v199_v17 = vpop.eup %198 }
  0xbb   :  { %v153_v18 = vmul.f32 %v199_v17, %v151_v16  ;;  %vm158_vm14 = vweird.f32 %v199_v17 }
  0xbc   :  { %vm159_vm15 = vmor %vm157_vm13, %vm158_vm14 }
  0xbd   :  { %v154_v19 = vsub.f32 1.0, %v153_v18 }
  0xbf   :  { %v155_v20 = vmul.f32 %v199_v17, %v154_v19 }
  0xc1   :  { %v156_v24 = vadd.f32 %v199_v17, %v155_v20 }
  0xc3   :  { %v160_v28 = vsel %vm159_vm15, %v199_v17, %v156_v24 }
  0xc4   :  { %v165_v29 = vsel %vm162_vm1, %v164_v26, %v160_v28 }
  0xc5   :  { %v166_v30 = vmul.f32 %v165_v29, %v149_v27 }
  0xc7   :  { %v167_v31 = vsub.f32 1.0, %v166_v30 }
  0xc9   :  { %168 = vst.msk [vmem:[%s330_s2] sm:$0xff] %vm43_vm0, %v167_v31 }
 0x11a   :  { %v172_v32 = vpop.permute.xlu1 %171 }
 0x11b   :  { %175 = vst.msk [vmem:[%s330_s2] sm:$0xff] %vm174_vm2, %v172_v32 }
 0x11c   :  { %180 = vsyncpa [#allocation6], 1 }
 0x11d   :  { %181 = vsyncpa [#allocation8], 1 }

</bundles_post_ra>
